<compile_context>
chip_gen: v7x
topology: tpu7x:2x2x1
jax: 0.10.0
libtpu: 0.0.40
codegen_flags: <defaults>
</compile_context>

<pallas_src>
import jax
import jax.numpy as jnp
from jax.experimental import pallas as pl
from jax.experimental.pallas import tpu as pltpu


def layer_norm_kernel(x_ref, gamma_ref, beta_ref, o_ref):
    eps = 1e-6

    x = x_ref[...].astype(jnp.float32)          # (TM, D)
    gamma = gamma_ref[...].astype(jnp.float32)  # (1, D)
    beta = beta_ref[...].astype(jnp.float32)    # (1, D)

    d = x.shape[-1]

    # mean / centered input
    mean = jnp.mean(x, axis=-1, keepdims=True)          # (TM, 1)
    xc = x - mean

    # unbiased std (torch.Tensor.std default: divide by D-1)
    var_unbiased = jnp.sum(xc * xc, axis=-1, keepdims=True) * (1.0 / (d - 1))
    std = jnp.sqrt(var_unbiased)
    denom = std + eps                                    # eps outside the sqrt

    # reciprocal on the EUP slot (free-ish), one Newton step -> ~f32 accuracy,
    # no VALU divide.
    inv = pl.reciprocal(denom, approx=True)
    inv = inv * (2.0 - denom * inv)                      # (TM, 1)

    # fold gamma into the scale, single fused multiply-add epilogue
    o_ref[...] = (xc * (gamma * inv) + beta).astype(o_ref.dtype)


def layer_norm(x, gamma, beta, *, tile_m=256):
    """LayerNorm over the last dim of x (any leading shape).

    x: [..., D]; gamma, beta: [D]. Returns same shape/dtype as x.
    """
    orig_shape = x.shape
    D = orig_shape[-1]
    x2 = x.reshape(-1, D)
    M = x2.shape[0]

    # Row tile: multiple of 8 (f32 sublane), no larger than the row count.
    tm = min(tile_m, M)
    tm = -(-tm // 8) * 8

    # Pad rows so every grid step sees a full tile (avoids ragged last tile).
    M_pad = -(-M // tm) * tm
    if M_pad != M:
        x2 = jnp.pad(x2, ((0, M_pad - M), (0, 0)))

    gamma2 = gamma.reshape(1, D)
    beta2 = beta.reshape(1, D)

    grid = (M_pad // tm,)

    # VMEM budget: double-buffered input + output tiles + resident params,
    # with headroom; stays well under v7x's 64 MiB physical VMEM.
    itemsize = jnp.dtype(x.dtype).itemsize
    vmem_bytes = 2 * tm * D * itemsize      # x tile, double-buffered
    vmem_bytes += 2 * tm * D * itemsize     # out tile, double-buffered
    vmem_bytes += 2 * 2 * D * 4             # gamma/beta
    vmem_limit = int(min(max(2 * vmem_bytes + (1 << 20), 4 << 20), 64 << 20))

    out = pl.pallas_call(
        layer_norm_kernel,
        out_shape=jax.ShapeDtypeStruct((M_pad, D), x.dtype),
        grid_spec=pltpu.PrefetchScalarGridSpec(
            num_scalar_prefetch=0,
            grid=grid,
            in_specs=[
                pl.BlockSpec((tm, D), lambda i: (i, 0)),   # x rows
                pl.BlockSpec((1, D), lambda i: (0, 0)),    # gamma (a_2)
                pl.BlockSpec((1, D), lambda i: (0, 0)),    # beta  (b_2)
            ],
            out_specs=pl.BlockSpec((tm, D), lambda i: (i, 0)),
        ),
        compiler_params=pltpu.CompilerParams(
            dimension_semantics=("parallel",),
            vmem_limit_bytes=vmem_limit,
        ),
    )(x2, gamma2, beta2)

    if M_pad != M:
        out = out[:M]
    return out.reshape(orig_shape)


def reference(x, gamma, beta, eps=1e-6):
    x32 = x.astype(jnp.float32)
    d = x.shape[-1]
    mean = jnp.mean(x32, axis=-1, keepdims=True)
    xc = x32 - mean
    std = jnp.sqrt(jnp.sum(xc * xc, axis=-1, keepdims=True) / (d - 1))
    return (gamma * xc / (std + eps) + beta).astype(x.dtype)


if __name__ == "__main__":
    # Small but lane-dense shapes: D = 128 (one full vreg lane width),
    # M = B*S = 512 rows -> grid of 2 parallel steps with tile_m = 256.
    B, S, D = 2, 256, 128
    key = jax.random.PRNGKey(0)
    kx, kg, kb = jax.random.split(key, 3)

    x = jax.random.normal(kx, (B, S, D), dtype=jnp.float32)

    # Module init is ones/zeros; perturb slightly so gamma/beta actually matter.
    gamma = jnp.ones((D,), dtype=jnp.float32) + 0.1 * jax.random.normal(kg, (D,), dtype=jnp.float32)
    beta = 0.1 * jax.random.normal(kb, (D,), dtype=jnp.float32)

    out = layer_norm(x, gamma, beta)
    out = jax.block_until_ready(out)

    ref = reference(x, gamma, beta)
    assert out.shape == (B, S, D)
    err = float(jnp.max(jnp.abs(out - ref)))
    assert jnp.allclose(out, ref, atol=1e-4, rtol=1e-4), err

    print("KERNEL_OK")
</pallas_src>

<mosaic_0001>
module attributes {stable_mosaic.version = 11 : i64} {
  func.func @layer_norm_kernel(%arg0: i32, %arg1: memref<256x128xf32, #tpu.memory_space<vmem>>, %arg2: memref<1x128xf32, #tpu.memory_space<vmem>>, %arg3: memref<1x128xf32, #tpu.memory_space<vmem>>, %arg4: memref<256x128xf32, #tpu.memory_space<vmem>>) attributes {dimension_semantics = [#tpu.dimension_semantics<parallel>], iteration_bounds = array<i64: 2>, scalar_prefetch = 0 : i64, scratch_operands = 0 : i64, tpu.core_type = #tpu.core_type<tc>, window_params = [{transform_indices = @transform_0, window_bounds = array<i64: 256, 128>}, {pipeline_mode = #tpu.pipeline_mode<synchronous>, transform_indices = @transform_1, window_bounds = array<i64: 1, 128>}, {pipeline_mode = #tpu.pipeline_mode<synchronous>, transform_indices = @transform_2, window_bounds = array<i64: 1, 128>}, {transform_indices = @transform_3, window_bounds = array<i64: 256, 128>}]} {
    %c0 = arith.constant 0 : index
    %c0_0 = arith.constant 0 : index
    %0 = vector.load %arg1[%c0, %c0_0] : memref<256x128xf32, #tpu.memory_space<vmem>>, vector<256x128xf32>
    %c0_1 = arith.constant 0 : index
    %c0_2 = arith.constant 0 : index
    %1 = vector.load %arg2[%c0_1, %c0_2] : memref<1x128xf32, #tpu.memory_space<vmem>>, vector<1x128xf32>
    %c0_3 = arith.constant 0 : index
    %c0_4 = arith.constant 0 : index
    %2 = vector.load %arg3[%c0_3, %c0_4] : memref<1x128xf32, #tpu.memory_space<vmem>>, vector<1x128xf32>
    %cst = arith.constant dense<0.000000e+00> : vector<256xf32>
    %3 = vector.multi_reduction <add>, %0, %cst [1] : vector<256x128xf32> to vector<256xf32>
    %4 = vector.shape_cast %3 : vector<256xf32> to vector<256x1xf32>
    %cst_5 = arith.constant 1.280000e+02 : f32
    %5 = vector.broadcast %cst_5 : f32 to vector<256x1xf32>
    %6 = arith.divf %4, %5 : vector<256x1xf32>
    %7 = vector.broadcast %6 : vector<256x1xf32> to vector<256x128xf32>
    %8 = arith.subf %0, %7 : vector<256x128xf32>
    %9 = arith.mulf %8, %8 : vector<256x128xf32>
    %cst_6 = arith.constant dense<0.000000e+00> : vector<256xf32>
    %10 = vector.multi_reduction <add>, %9, %cst_6 [1] : vector<256x128xf32> to vector<256xf32>
    %11 = vector.shape_cast %10 : vector<256xf32> to vector<256x1xf32>
    %cst_7 = arith.constant 0.00787401571 : f32
    %12 = vector.broadcast %cst_7 : f32 to vector<256x1xf32>
    %13 = arith.mulf %11, %12 : vector<256x1xf32>
    %14 = math.sqrt %13 : vector<256x1xf32>
    %cst_8 = arith.constant 9.99999997E-7 : f32
    %15 = vector.broadcast %cst_8 : f32 to vector<256x1xf32>
    %16 = arith.addf %14, %15 : vector<256x1xf32>
    %17 = tpu.reciprocal %16 {approx = true} : vector<256x1xf32> -> vector<256x1xf32>
    %18 = arith.mulf %16, %17 : vector<256x1xf32>
    %cst_9 = arith.constant 2.000000e+00 : f32
    %19 = vector.broadcast %cst_9 : f32 to vector<256x1xf32>
    %20 = arith.subf %19, %18 : vector<256x1xf32>
    %21 = arith.mulf %17, %20 : vector<256x1xf32>
    %22 = vector.broadcast %1 : vector<1x128xf32> to vector<256x128xf32>
    %23 = vector.broadcast %21 : vector<256x1xf32> to vector<256x128xf32>
    %24 = arith.mulf %22, %23 : vector<256x128xf32>
    %25 = arith.mulf %8, %24 : vector<256x128xf32>
    %26 = vector.broadcast %2 : vector<1x128xf32> to vector<256x128xf32>
    %27 = arith.addf %25, %26 : vector<256x128xf32>
    %c0_10 = arith.constant 0 : index
    %c0_11 = arith.constant 0 : index
    %28 = vector.load %arg4[%c0_10, %c0_11] : memref<256x128xf32, #tpu.memory_space<vmem>>, vector<256x128xf32>
    tpu.vector_store %arg4[%c0_10, %c0_11], %27 {strides = array<i32>} : memref<256x128xf32, #tpu.memory_space<vmem>>, vector<256x128xf32>,
    return
  }
  func.func @transform_0(%arg0: i32) -> (i32, i32) {
    %c0_i32 = arith.constant 0 : i32
    %c0_i32_0 = arith.constant 0 : i32
    return %arg0, %c0_i32 : i32, i32
  }
  func.func @transform_1(%arg0: i32) -> (i32, i32) {
    %c0_i32 = arith.constant 0 : i32
    %c0_i32_0 = arith.constant 0 : i32
    %c0_i32_1 = arith.constant 0 : i32
    return %c0_i32, %c0_i32_0 : i32, i32
  }
  func.func @transform_2(%arg0: i32) -> (i32, i32) {
    %c0_i32 = arith.constant 0 : i32
    %c0_i32_0 = arith.constant 0 : i32
    %c0_i32_1 = arith.constant 0 : i32
    return %c0_i32, %c0_i32_0 : i32, i32
  }
  func.func @transform_3(%arg0: i32) -> (i32, i32) {
    %c0_i32 = arith.constant 0 : i32
    %c0_i32_0 = arith.constant 0 : i32
    return %arg0, %c0_i32 : i32, i32
  }
}

</mosaic_0001>

<bundles_post_ra>
// kernel: tpu_custom_call.1
= control target key start
LH: loop header
LB: loop body
LE: loop exit
PB: predicated region body
PF: predicated region fallthrough
CT: control target
= control target key end

     0   :  { %8 = vsyncpa [#allocation3], 0  ;;  %s2415_s0 = inlined_call_operand.hbm [shape: f32[512,128], index: 0, kind: input, shape index: {}]   ;;  %s2416_s1 = inlined_call_operand.vmem [shape: f32[1,128], index: 1, kind: input, shape index: {}]   ;;  %s2417_s2 = inlined_call_operand.vmem [shape: f32[1,128], index: 2, kind: input, shape index: {}]   ;;  %s2418_s3 = inlined_call_operand.hbm [shape: f32[512,128], index: 3, kind: output, shape index: {}]  }
   0x1   :  { %10 = vsyncpa [#allocation3 + $0x1], 0 }
   0x2   :  { %11 = vsyncpa [#allocation4], 0 }
   0x3   :  { %13 = vsyncpa [#allocation4 + $0x1], 0  ;;  %s1414_s12 = smov 0   ;;  %s1416_s13 = smov 0  }
   0x4   :  { %s1418_s14 = smov 0   ;;  %s1420_s15 = smov 0  }
   0x5 LB: > { %s1435_s16 = sadd.s32 4294967295, %s1386_s15   ;;  %s1093_s17 = sadd.s32 4294967294, %s1386_s15   ;;  %s1386_s15 = sphi %s1420_s15, %s2432_s15   ;;  %s1382_s14 = sphi %s1418_s14, %s2431_s14   ;;  %s1378_s13 = sphi %s1416_s13, %s2430_s13   ;;  %s1374_s12 = sphi %s1414_s12, %s2429_s12  }
   0x6   : > { %s1439_s18 = sadd.s32 1, %s1386_s15   ;;  %s26_s19 = sadd.s32 1, %s1382_s14 }
   0x7   : > { %s23_s20 = ssub.s32 %s1386_s15, %s1439_s18  ;;  %p33_p0 = scmp.ne.s32.totalorder %s1382_s14, %s1378_s13 }
   0x8   : > { %p24_p1 = scmp.eq.s32.totalorder %s23_s20, 0  ;;  %p34_p2 = scmp.eq.s32.totalorder %s1386_s15, 0 }
   0x9   : > { %p39_p3 = scmp.ne.s32.totalorder %s1378_s13, %s1374_s12  ;;  %p40_p4 = scmp.eq.s32.totalorder %s1435_s16, 0 }
   0xa   : > { %s1451_s21 = scalar_select %p24_p1, %s1382_s14, %s26_s19  }
   0xb   : > { %p1453_p5 = por %p34_p2, %p33_p0  ;;  %p1457_p6 = por %p40_p4, %p39_p3 }
   0xc   : > { %p105_p7 = scmp.eq.s32.totalorder %s1435_s16, 1  ;;  %p111_p8 = scmp.eq.s32.totalorder %s1093_s17, 1 }
   0xd   : > { %p1123_p10 = scmp.lt.s32.totalorder %s1386_s15, 2  ;;  %s137_s26 = sand.u32 1, %s1382_s14  }
   0xe   : > { %p1464_p11 = por %p105_p7, %p33_p0  ;;  %p1468_p12 = por %p111_p8, %p39_p3 }
   0xf   : > { %s1109_s27 = sshll.u32 %s1386_s15, 12  ;;  %s1096_s28 = sshll.u32 %s137_s26, 8 }
  0x10   : > { %s2422_s24 = scalar_select %p1464_p11, 1, 0 }
  0x11   : > { %s2423_s25 = scalar_select %p1468_p12, 1, 0 }
  0x12   : > { %s1477_s4 = scalar_lea.hbm %s2415_s0, %s1109_s27  ;;  %s141_s5 = scalar_lea.vmem [#allocation2], %s1096_s28 }
  0x13   : > { %s148_s6 = sshll.u32 %s141_s5, 4  ;;  %p1481_p13 = pnand %p1123_p10, %p1453_p5  ;;  %s1485_s6 = int_to_ptr.vmem [resolvable:$true] %s148_s6 }
  0x14   : > { %s1487_s8 = scalar_lea.sflag [#allocation3], %s137_s26  ;;  %s1290_s9 = scalar_lea.hbm %s1477_s4, 4096 }
  0x15   : > { %p1291_p0 = scmp.ne.s32.totalorder %s1477_s4, %s1290_s9  ;;  %p1292_p1 = pneg %p1481_p13 }
  0x16   : > { %s1295_s17 = scalar_lea.hbm %s2415_s0, 8192  ;;  %p1296_p4 = scmp.lt.u32.totalorder %s1477_s4, %s2415_s0 }
  0x17   : > { %p1293_p2 = pnand %p1292_p1, %p1291_p0  ;;  %p1297_p5 = scmp.lt.u32.totalorder %s1295_s17, %s1290_s9 }
  0x18   : > { %p1299_p8 = scmp.lt.u32.totalorder %s1290_s9, %s1477_s4 }
  0x19   : > { %p1294_p3 = pneg %p1293_p2  ;;  %p1298_p7 = por %p1297_p5, %p1296_p4 }
  0x1b   : > { %p1300_p10 = por %p1299_p8, %p1298_p7 }
  0x1d   : > { %p1301_p9 = pnand %p1300_p10, %p1294_p3 }
  0x1f   : > { %1304 = shalt.err (!%p1301_p9)
}
  0x20   : > { %s1305_s22 = scalar_lea.vmem %s1485_s6, 4096  ;;  %s1388_s26 = smov [#allocation2]  }
  0x21   : > { %p1306_p0 = scmp.ne.s32.totalorder %s1485_s6, %s1305_s22  ;;  %s1310_s27 = sshll.u32 %s1388_s26, 4  ;;  %s1311_s27 = int_to_ptr.vmem [resolvable:$false] %s1310_s27 }
  0x22   : > { %s1312_s28 = scalar_lea.vmem %s1311_s27, 8192  ;;  %p1313_p11 = scmp.lt.s32.totalorder %s1485_s6, %s1311_s27 }
  0x23   : > { %p1308_p2 = pnand %p1306_p0, %p1292_p1  ;;  %p1314_p4 = scmp.lt.s32.totalorder %s1312_s28, %s1305_s22 }
  0x25   : > { %p1309_p12 = pneg %p1308_p2  ;;  %p1315_p5 = por %p1314_p4, %p1313_p11 }
  0x27   : > { %p1316_p7 = pnand %p1315_p5, %p1309_p12 }
  0x29   : > { %1319 = shalt.err (!%p1316_p7)
}
  0x2a   : > { %s1389_s29 = smov 128   ;;  %s1390_s30 = smov 8  }
  0x2b   : > { %1118 = dma.hbm_to_vmem [thread:$0]  (!%p1481_p13), %s1477_s4, 4096, %s1485_s6, %s1487_s8, %s1389_s29, %s1389_s29, %s1390_s30  }
  0x2c   : > { %p1099_p9 = scmp.ge.s32.totalorder %s1386_s15, 1  ;;  %p156_p1 = scmp.lt.s32.totalorder %s1386_s15, 3 }
  0x2e   : > { %p157_p3 = pnand %p1099_p9, %p156_p1 }
  0x2f   : > { %s1518_s5 = sand.u32 (!%p157_p3), 1, %s1378_s13  }
  0x30   : > { %160 = sbr.rel (%p157_p3) target bundleno = 520 (0x208), region = 32  ;;  %s1100_s9 = sshll.u32 (!%p157_p3), %s1518_s5, 8 }
  0x31   : > { %s163_s10 = scalar_lea.sflag (!%p157_p3), [#allocation3], %s1518_s5  ;;  %s1524_s11 = scalar_lea.vmem (!%p157_p3), [#allocation2], %s1100_s9 }
  0x37   : > { %1365 = dma.done.wait (%p1457_p6), %s163_s10, 4096  }
  0x38   : > { %1367 = vsyncadd (%p1457_p6), %s163_s10, 4294963200  ;;  %v1531_v0 = vld [vmem:[%s1524_s11] sm:$0xff]  ;;  %v1534_v1 = vld [vmem:[%s1524_s11 + $0x10] sm:$0xff]  ;;  %s1979_s8 = scalar_lea.vmem [#allocation5], %s1100_s9  ;;  %s1110_s20 = sshll.u32 %s1435_s16, 12 }
  0x39   : > { %225 = vadd.xlane.f32.xlu0 %v1531_v0  ;;  %229 = vadd.xlane.f32.xlu1 %v1534_v1  ;;  %v1539_v2 = vld [vmem:[%s1524_s11 + $0x8] sm:$0xff]  ;;  %v1542_v3 = vld [vmem:[%s1524_s11 + $0x18] sm:$0xff]  ;;  %v1547_v4 = vld [vmem:[%s1524_s11 + $0x20] sm:$0xff]  ;;  %s1020_s22 = sshll.u32 %s1979_s8, 4  ;;  %s2366_s28 = scalar_lea.hbm %s2418_s3, %s1110_s20  ;;  %s2369_s22 = int_to_ptr.vmem [resolvable:$true] %s1020_s22 }
  0x3a   : > { %v1550_v5 = vld [vmem:[%s1524_s11 + $0x28] sm:$0xff]  ;;  %v1555_v6 = vld [vmem:[%s1524_s11 + $0x30] sm:$0xff]  ;;  %v1558_v7 = vld [vmem:[%s1524_s11 + $0x38] sm:$0xff]  ;;  %s1007_s16 = scalar_lea.sflag [#allocation4], %s1518_s5  ;;  %s1320_s29 = scalar_lea.vmem %s2369_s22, 4096 }
  0x3b   : > { %v1563_v8 = vld [vmem:[%s1524_s11 + $0x40] sm:$0xff]  ;;  %v1566_v9 = vld [vmem:[%s1524_s11 + $0x48] sm:$0xff]  ;;  %v1571_v10 = vld [vmem:[%s1524_s11 + $0x50] sm:$0xff]  ;;  %p1321_p6 = scmp.ne.s32.totalorder %s2369_s22, %s1320_s29  ;;  %p2426_p11 = scmp.ne.s32.totalorder %s2422_s24, 0 }
  0x3c   : > { %v1574_v11 = vld [vmem:[%s1524_s11 + $0x58] sm:$0xff]  ;;  %v1579_v12 = vld [vmem:[%s1524_s11 + $0x60] sm:$0xff]  ;;  %v1582_v13 = vld [vmem:[%s1524_s11 + $0x68] sm:$0xff]  ;;  %s1391_s30 = smov [#allocation5]  }
  0x3d   : > { %227 = vadd.xlane.f32.xlu0 %v1539_v2  ;;  %231 = vadd.xlane.f32.xlu1 %v1542_v3  ;;  %v1587_v14 = vld [vmem:[%s1524_s11 + $0x70] sm:$0xff]  ;;  %v1590_v15 = vld [vmem:[%s1524_s11 + $0x78] sm:$0xff]  ;;  %v1595_v16 = vld [vmem:[%s1524_s11 + $0x80] sm:$0xff]  ;;  %p1322_p12 = pnand %p1321_p6, %p2426_p11  ;;  %s1324_s9 = sshll.u32 %s1391_s30, 4  ;;  %s1325_s9 = int_to_ptr.vmem [resolvable:$false] %s1324_s9 }
  0x3e   : > { %v1598_v17 = vld [vmem:[%s1524_s11 + $0x88] sm:$0xff]  ;;  %v1603_v18 = vld [vmem:[%s1524_s11 + $0x90] sm:$0xff]  ;;  %v1606_v19 = vld [vmem:[%s1524_s11 + $0x98] sm:$0xff]  ;;  %s1326_s10 = scalar_lea.vmem %s1325_s9, 8192  ;;  %p1327_p8 = scmp.lt.s32.totalorder %s2369_s22, %s1325_s9 }
  0x3f   : > { %v1611_v20 = vld [vmem:[%s1524_s11 + $0xa0] sm:$0xff]  ;;  %v1614_v21 = vld [vmem:[%s1524_s11 + $0xa8] sm:$0xff]  ;;  %v1619_v22 = vld [vmem:[%s1524_s11 + $0xb0] sm:$0xff]  ;;  %p1323_p13 = pneg %p1322_p12  ;;  %p1328_p10 = scmp.lt.s32.totalorder %s1326_s10, %s1320_s29 }
  0x40   : > { %v1622_v23 = vld [vmem:[%s1524_s11 + $0xb8] sm:$0xff]  ;;  %v1627_v24 = vld [vmem:[%s1524_s11 + $0xc0] sm:$0xff]  ;;  %v1630_v25 = vld [vmem:[%s1524_s11 + $0xc8] sm:$0xff] }
  0x41   : > { %233 = vadd.xlane.f32.xlu0 %v1547_v4  ;;  %235 = vadd.xlane.f32.xlu1 %v1550_v5  ;;  %v1635_v26 = vld [vmem:[%s1524_s11 + $0xd0] sm:$0xff]  ;;  %v1638_v27 = vld [vmem:[%s1524_s11 + $0xd8] sm:$0xff]  ;;  %v1643_v28 = vld [vmem:[%s1524_s11 + $0xe0] sm:$0xff]  ;;  %p1329_p0 = por %p1328_p10, %p1327_p8 }
  0x42   : > { %v1646_v29 = vld [vmem:[%s1524_s11 + $0xe8] sm:$0xff]  ;;  %v1651_v30 = vld [vmem:[%s1524_s11 + $0xf0] sm:$0xff]  ;;  %v1654_v31 = vld [vmem:[%s1524_s11 + $0xf8] sm:$0xff] }
  0x43   : > { %p1330_p2 = pnand %p1329_p0, %p1323_p13 }
  0x45   : > { %237 = vadd.xlane.f32.xlu0 %v1555_v6  ;;  %239 = vadd.xlane.f32.xlu1 %v1558_v7 }
  0x49   : > { %241 = vadd.xlane.f32.xlu0 %v1563_v8  ;;  %243 = vadd.xlane.f32.xlu1 %v1566_v9 }
  0x4d   : > { %245 = vadd.xlane.f32.xlu0 %v1571_v10  ;;  %247 = vadd.xlane.f32.xlu1 %v1574_v11 }
  0x51   : > { %249 = vadd.xlane.f32.xlu0 %v1579_v12  ;;  %251 = vadd.xlane.f32.xlu1 %v1582_v13 }
  0x55   : > { %253 = vadd.xlane.f32.xlu0 %v1587_v14  ;;  %255 = vadd.xlane.f32.xlu1 %v1590_v15 }
  0x59   : > { %257 = vadd.xlane.f32.xlu0 %v1595_v16  ;;  %259 = vadd.xlane.f32.xlu1 %v1598_v17 }
  0x5d   : > { %261 = vadd.xlane.f32.xlu0 %v1603_v18  ;;  %263 = vadd.xlane.f32.xlu1 %v1606_v19 }
  0x61   : > { %265 = vadd.xlane.f32.xlu0 %v1611_v20  ;;  %267 = vadd.xlane.f32.xlu1 %v1614_v21 }
  0x65   : > { %269 = vadd.xlane.f32.xlu0 %v1619_v22  ;;  %271 = vadd.xlane.f32.xlu1 %v1622_v23 }
  0x69   : > { %273 = vadd.xlane.f32.xlu0 %v1627_v24  ;;  %275 = vadd.xlane.f32.xlu1 %v1630_v25 }
  0x6d   : > { %277 = vadd.xlane.f32.xlu0 %v1635_v26  ;;  %279 = vadd.xlane.f32.xlu1 %v1638_v27 }
  0x71   : > { %281 = vadd.xlane.f32.xlu0 %v1643_v28  ;;  %283 = vadd.xlane.f32.xlu1 %v1646_v29 }
  0x75   : > { %285 = vadd.xlane.f32.xlu0 %v1651_v30  ;;  %287 = vadd.xlane.f32.xlu1 %v1654_v31 }
  0xc6   : > { %v226_v32 = vpop.xlane.xlu0 %225  ;;  %v230_v33 = vpop.xlane.xlu1 %229 }
  0xc7   : > { %v290_v34 = vmul.f32 0.0078125, %v226_v32  ;;  %v292_v35 = vmul.f32 0.0078125, %v230_v33 }
  0xc9   : > { %v1659_v36 = vsub.f32 %v1531_v0, %v290_v34  ;;  %v1662_v37 = vsub.f32 %v1534_v1, %v292_v35 }
  0xca   : > { %v228_v38 = vpop.xlane.xlu0 %227  ;;  %v232_v39 = vpop.xlane.xlu1 %231 }
  0xcb   : > { %v291_v40 = vmul.f32 0.0078125, %v228_v38  ;;  %v354_v41 = vmul.f32 %v1659_v36, %v1659_v36  ;;  %v293_v42 = vmul.f32 0.0078125, %v232_v39  ;;  %v356_v45 = vmul.f32 %v1662_v37, %v1662_v37 }
  0xcd   : > { %v1667_v43 = vsub.f32 %v1539_v2, %v291_v40  ;;  %386 = vadd.xlane.f32.xlu0 %v354_v41  ;;  %v1670_v44 = vsub.f32 %v1542_v3, %v293_v42 }
  0xce   : > { %v234_v46 = vpop.xlane.xlu0 %233  ;;  %v236_v47 = vpop.xlane.xlu1 %235 }
  0xcf   : > { %v294_v48 = vmul.f32 0.0078125, %v234_v46  ;;  %v355_v49 = vmul.f32 %v1667_v43, %v1667_v43  ;;  %v295_v50 = vmul.f32 0.0078125, %v236_v47  ;;  %v357_v53 = vmul.f32 %v1670_v44, %v1670_v44 }
  0xd1   : > { %v1677_v51 = vsub.f32 %v1547_v4, %v294_v48  ;;  %390 = vadd.xlane.f32.xlu0 %v356_v45  ;;  %388 = vadd.xlane.f32.xlu1 %v355_v49  ;;  %v1680_v52 = vsub.f32 %v1550_v5, %v295_v50 }
  0xd2   : > { %v238_v54 = vpop.xlane.xlu0 %237  ;;  %v240_v55 = vpop.xlane.xlu1 %239 }
  0xd3   : > { %v296_v56 = vmul.f32 0.0078125, %v238_v54  ;;  %v358_v57 = vmul.f32 %v1677_v51, %v1677_v51  ;;  %v297_v58 = vmul.f32 0.0078125, %v240_v55  ;;  %v359_v61 = vmul.f32 %v1680_v52, %v1680_v52 }
  0xd5   : > { %v1687_v59 = vsub.f32 %v1555_v6, %v296_v56  ;;  %392 = vadd.xlane.f32.xlu1 %v357_v53  ;;  %394 = vadd.xlane.f32.xlu0 %v358_v57  ;;  %v1690_v60 = vsub.f32 %v1558_v7, %v297_v58 }
  0xd6   : > { %v242_v62 = vpop.xlane.xlu0 %241  ;;  %v244_v63 = vpop.xlane.xlu1 %243 }
  0xd7   : > { %v298_v0 = vmul.f32 0.0078125, %v242_v62  ;;  %v360_v1 = vmul.f32 %v1687_v59, %v1687_v59  ;;  %v299_v2 = vmul.f32 0.0078125, %v244_v63  ;;  %v361_v5 = vmul.f32 %v1690_v60, %v1690_v60 }
  0xd9   : > { %v1697_v3 = vsub.f32 %v1563_v8, %v298_v0  ;;  %396 = vadd.xlane.f32.xlu1 %v359_v61  ;;  %398 = vadd.xlane.f32.xlu0 %v360_v1  ;;  %v1700_v4 = vsub.f32 %v1566_v9, %v299_v2 }
  0xda   : > { %v246_v6 = vpop.xlane.xlu0 %245  ;;  %v248_v7 = vpop.xlane.xlu1 %247 }
  0xdb   : > { %v300_v32 = vmul.f32 0.0078125, %v246_v6  ;;  %v362_v33 = vmul.f32 %v1697_v3, %v1697_v3  ;;  %v301_v34 = vmul.f32 0.0078125, %v248_v7  ;;  %v363_v9 = vmul.f32 %v1700_v4, %v1700_v4 }
  0xdd   : > { %v1707_v35 = vsub.f32 %v1571_v10, %v300_v32  ;;  %400 = vadd.xlane.f32.xlu1 %v361_v5  ;;  %402 = vadd.xlane.f32.xlu0 %v362_v33  ;;  %v1710_v8 = vsub.f32 %v1574_v11, %v301_v34 }
  0xde   : > { %v250_v38 = vpop.xlane.xlu0 %249  ;;  %v252_v39 = vpop.xlane.xlu1 %251 }
  0xdf   : > { %v302_v40 = vmul.f32 0.0078125, %v250_v38  ;;  %v364_v41 = vmul.f32 %v1707_v35, %v1707_v35  ;;  %v303_v42 = vmul.f32 0.0078125, %v252_v39  ;;  %v365_v11 = vmul.f32 %v1710_v8, %v1710_v8 }
  0xe1   : > { %v1717_v45 = vsub.f32 %v1579_v12, %v302_v40  ;;  %404 = vadd.xlane.f32.xlu1 %v363_v9  ;;  %406 = vadd.xlane.f32.xlu0 %v364_v41  ;;  %v1720_v10 = vsub.f32 %v1582_v13, %v303_v42 }
  0xe2   : > { %v254_v46 = vpop.xlane.xlu0 %253  ;;  %v256_v47 = vpop.xlane.xlu1 %255 }
  0xe3   : > { %v304_v48 = vmul.f32 0.0078125, %v254_v46  ;;  %v366_v49 = vmul.f32 %v1717_v45, %v1717_v45  ;;  %v305_v50 = vmul.f32 0.0078125, %v256_v47  ;;  %v367_v13 = vmul.f32 %v1720_v10, %v1720_v10 }
  0xe5   : > { %v1727_v53 = vsub.f32 %v1587_v14, %v304_v48  ;;  %408 = vadd.xlane.f32.xlu1 %v365_v11  ;;  %410 = vadd.xlane.f32.xlu0 %v366_v49  ;;  %v1730_v12 = vsub.f32 %v1590_v15, %v305_v50 }
  0xe6   : > { %v258_v54 = vpop.xlane.xlu0 %257  ;;  %v260_v55 = vpop.xlane.xlu1 %259 }
  0xe7   : > { %v306_v56 = vmul.f32 0.0078125, %v258_v54  ;;  %v368_v57 = vmul.f32 %v1727_v53, %v1727_v53  ;;  %v307_v58 = vmul.f32 0.0078125, %v260_v55  ;;  %v369_v15 = vmul.f32 %v1730_v12, %v1730_v12 }
  0xe9   : > { %v1737_v61 = vsub.f32 %v1595_v16, %v306_v56  ;;  %412 = vadd.xlane.f32.xlu1 %v367_v13  ;;  %414 = vadd.xlane.f32.xlu0 %v368_v57  ;;  %v1740_v14 = vsub.f32 %v1598_v17, %v307_v58 }
  0xea   : > { %v262_v62 = vpop.xlane.xlu0 %261  ;;  %v264_v63 = vpop.xlane.xlu1 %263 }
  0xeb   : > { %v308_v0 = vmul.f32 0.0078125, %v262_v62  ;;  %v370_v1 = vmul.f32 %v1737_v61, %v1737_v61  ;;  %v309_v2 = vmul.f32 0.0078125, %v264_v63  ;;  %v371_v17 = vmul.f32 %v1740_v14, %v1740_v14 }
  0xed   : > { %v1747_v5 = vsub.f32 %v1603_v18, %v308_v0  ;;  %416 = vadd.xlane.f32.xlu1 %v369_v15  ;;  %418 = vadd.xlane.f32.xlu0 %v370_v1  ;;  %v1750_v16 = vsub.f32 %v1606_v19, %v309_v2 }
  0xee   : > { %v266_v6 = vpop.xlane.xlu0 %265  ;;  %v268_v7 = vpop.xlane.xlu1 %267 }
  0xef   : > { %v310_v32 = vmul.f32 0.0078125, %v266_v6  ;;  %v372_v33 = vmul.f32 %v1747_v5, %v1747_v5  ;;  %v311_v34 = vmul.f32 0.0078125, %v268_v7  ;;  %v373_v19 = vmul.f32 %v1750_v16, %v1750_v16 }
  0xf1   : > { %v1757_v9 = vsub.f32 %v1611_v20, %v310_v32  ;;  %420 = vadd.xlane.f32.xlu1 %v371_v17  ;;  %422 = vadd.xlane.f32.xlu0 %v372_v33  ;;  %v1760_v18 = vsub.f32 %v1614_v21, %v311_v34 }
  0xf2   : > { %v270_v38 = vpop.xlane.xlu0 %269  ;;  %v272_v39 = vpop.xlane.xlu1 %271 }
  0xf3   : > { %v312_v40 = vmul.f32 0.0078125, %v270_v38  ;;  %v374_v41 = vmul.f32 %v1757_v9, %v1757_v9  ;;  %v313_v42 = vmul.f32 0.0078125, %v272_v39  ;;  %v375_v21 = vmul.f32 %v1760_v18, %v1760_v18 }
  0xf5   : > { %v1767_v11 = vsub.f32 %v1619_v22, %v312_v40  ;;  %424 = vadd.xlane.f32.xlu1 %v373_v19  ;;  %426 = vadd.xlane.f32.xlu0 %v374_v41  ;;  %v1770_v20 = vsub.f32 %v1622_v23, %v313_v42 }
  0xf6   : > { %v274_v46 = vpop.xlane.xlu0 %273  ;;  %v276_v47 = vpop.xlane.xlu1 %275 }
  0xf7   : > { %v314_v48 = vmul.f32 0.0078125, %v274_v46  ;;  %v376_v49 = vmul.f32 %v1767_v11, %v1767_v11  ;;  %v315_v50 = vmul.f32 0.0078125, %v276_v47  ;;  %v377_v23 = vmul.f32 %v1770_v20, %v1770_v20 }
  0xf9   : > { %v1777_v13 = vsub.f32 %v1627_v24, %v314_v48  ;;  %428 = vadd.xlane.f32.xlu1 %v375_v21  ;;  %430 = vadd.xlane.f32.xlu0 %v376_v49  ;;  %v1780_v22 = vsub.f32 %v1630_v25, %v315_v50 }
  0xfa   : > { %v278_v54 = vpop.xlane.xlu0 %277  ;;  %v280_v55 = vpop.xlane.xlu1 %279 }
  0xfb   : > { %v316_v56 = vmul.f32 0.0078125, %v278_v54  ;;  %v378_v57 = vmul.f32 %v1777_v13, %v1777_v13  ;;  %v317_v58 = vmul.f32 0.0078125, %v280_v55  ;;  %v379_v25 = vmul.f32 %v1780_v22, %v1780_v22 }
  0xfd   : > { %v1787_v15 = vsub.f32 %v1635_v26, %v316_v56  ;;  %432 = vadd.xlane.f32.xlu1 %v377_v23  ;;  %434 = vadd.xlane.f32.xlu0 %v378_v57  ;;  %v1790_v24 = vsub.f32 %v1638_v27, %v317_v58 }
  0xfe   : > { %v282_v62 = vpop.xlane.xlu0 %281  ;;  %v284_v63 = vpop.xlane.xlu1 %283 }
  0xff   : > { %v318_v0 = vmul.f32 0.0078125, %v282_v62  ;;  %v380_v1 = vmul.f32 %v1787_v15, %v1787_v15  ;;  %v319_v2 = vmul.f32 0.0078125, %v284_v63  ;;  %v381_v27 = vmul.f32 %v1790_v24, %v1790_v24 }
 0x101   : > { %v1797_v17 = vsub.f32 %v1643_v28, %v318_v0  ;;  %436 = vadd.xlane.f32.xlu1 %v379_v25  ;;  %438 = vadd.xlane.f32.xlu0 %v380_v1  ;;  %v1800_v26 = vsub.f32 %v1646_v29, %v319_v2 }
 0x102   : > { %v286_v6 = vpop.xlane.xlu0 %285  ;;  %v288_v7 = vpop.xlane.xlu1 %287 }
 0x103   : > { %v320_v32 = vmul.f32 0.0078125, %v286_v6  ;;  %v382_v33 = vmul.f32 %v1797_v17, %v1797_v17  ;;  %v321_v34 = vmul.f32 0.0078125, %v288_v7  ;;  %v383_v29 = vmul.f32 %v1800_v26, %v1800_v26 }
 0x105   : > { %v1807_v19 = vsub.f32 %v1651_v30, %v320_v32  ;;  %440 = vadd.xlane.f32.xlu1 %v381_v27  ;;  %442 = vadd.xlane.f32.xlu0 %v382_v33  ;;  %v1810_v28 = vsub.f32 %v1654_v31, %v321_v34 }
 0x107   : > { %v384_v38 = vmul.f32 %v1807_v19, %v1807_v19  ;;  %v385_v39 = vmul.f32 %v1810_v28, %v1810_v28 }
 0x109   : > { %444 = vadd.xlane.f32.xlu1 %v383_v29  ;;  %446 = vadd.xlane.f32.xlu0 %v384_v38 }
 0x10d   : > { %448 = vadd.xlane.f32.xlu1 %v385_v39 }
 0x15a   : > { %v387_v40 = vpop.xlane.xlu0 %386 }
 0x15b   : > { %v450_v30 = vmul.f32 0.007874016, %v387_v40 }
 0x15d   : > { %1161 = vrsqrt.f32 %v450_v30  ;;  %vm484_vm0 = vcmp.eq.f32.partialorder %v450_v30, inf  ;;  %vm486_vm1 = vcmp.eq.f32.partialorder %v450_v30, 0.0  ;;  %v487_v58 = vand.u32 2147483648, %v450_v30 }
 0x15e   : > { %v389_v41 = vpop.xlane.xlu1 %388  ;;  %v391_v42 = vpop.xlane.xlu0 %390 }
 0x15f   : > { %v451_v21 = vmul.f32 0.007874016, %v389_v41  ;;  %v452_v31 = vmul.f32 0.007874016, %v391_v42 }
 0x161   : > { %1163 = vrsqrt.f32 %v451_v21  ;;  %vm491_vm2 = vcmp.eq.f32.partialorder %v451_v21, inf  ;;  %vm493_vm3 = vcmp.eq.f32.partialorder %v451_v21, 0.0  ;;  %v494_v25 = vand.u32 2147483648, %v451_v21 }
 0x162   : > { %1165 = vrsqrt.f32 %v452_v31  ;;  %v393_v46 = vpop.xlane.xlu1 %392  ;;  %v395_v47 = vpop.xlane.xlu0 %394  ;;  %vm498_vm4 = vcmp.eq.f32.partialorder %v452_v31, inf  ;;  %vm500_vm5 = vcmp.eq.f32.partialorder %v452_v31, 0.0  ;;  %v501_v63 = vand.u32 2147483648, %v452_v31 }
 0x163   : > { %v1818_v48 = vmul.f32 0.007874016, %v393_v46  ;;  %v1820_v49 = vmul.f32 0.007874016, %v395_v47 }
 0x165   : > { %1167 = vrsqrt.f32 %v1818_v48  ;;  %vm505_vm6 = vcmp.eq.f32.partialorder %v1818_v48, inf  ;;  %vm507_vm7 = vcmp.eq.f32.partialorder %v1818_v48, 0.0  ;;  %v508_v29 = vand.u32 2147483648, %v1818_v48 }
 0x166   : > { %1169 = vrsqrt.f32 %v1820_v49  ;;  %v397_v50 = vpop.xlane.xlu1 %396  ;;  %v399_v23 = vpop.xlane.xlu0 %398  ;;  %vm512_vm8 = vcmp.eq.f32.partialorder %v1820_v49, inf  ;;  %vm514_vm9 = vcmp.eq.f32.partialorder %v1820_v49, 0.0  ;;  %v515_v39 = vand.u32 2147483648, %v1820_v49 }
 0x167   : > { %v1162_v54 = vpop.eup %1161  ;;  %v1824_v55 = vmul.f32 0.007874016, %v397_v50  ;;  %v1826_v56 = vmul.f32 0.007874016, %v399_v23 }
 0x168   : > { %v483_v57 = vmul.f32 %v1162_v54, %v450_v30 }
 0x169   : > { %1171 = vrsqrt.f32 %v1824_v55  ;;  %vm519_vm10 = vcmp.eq.f32.partialorder %v1824_v55, inf  ;;  %vm521_vm11 = vcmp.eq.f32.partialorder %v1824_v55, 0.0  ;;  %v522_v47 = vand.u32 2147483648, %v1824_v55 }
 0x16a   : > { %v485_v62 = vsel %vm484_vm0, %v450_v30, %v483_v57  ;;  %1173 = vrsqrt.f32 %v1826_v56  ;;  %v401_v0 = vpop.xlane.xlu1 %400  ;;  %v403_v1 = vpop.xlane.xlu0 %402  ;;  %vm526_vm12 = vcmp.eq.f32.partialorder %v1826_v56, inf  ;;  %vm528_vm13 = vcmp.eq.f32.partialorder %v1826_v56, 0.0 }
 0x16b   : > { %v1164_v2 = vpop.eup %1163  ;;  %v488_v27 = vsel %vm486_vm1, %v487_v58, %v485_v62  ;;  %v1833_v6 = vmul.f32 0.007874016, %v401_v0  ;;  %v1835_v7 = vmul.f32 0.007874016, %v403_v1 }
 0x16c   : > { %v1166_v32 = vpop.eup %1165  ;;  %v1837_v33 = vadd.f32 1e-06, %v488_v27  ;;  %v490_v34 = vmul.f32 %v1164_v2, %v451_v21 }
 0x16d   : > { %v497_v38 = vmul.f32 %v1166_v32, %v452_v31  ;;  %1175 = vrsqrt.f32 %v1833_v6  ;;  %vm533_vm14 = vcmp.eq.f32.partialorder %v1833_v6, inf  ;;  %vm535_vm15 = vcmp.eq.f32.partialorder %v1833_v6, 0.0 }
 0x16e   : > { %1177 = vrcp.f32 %v1837_v33  ;;  %v492_v40 = vsel %vm491_vm2, %v451_v21, %v490_v34  ;;  %v405_v30 = vpop.xlane.xlu1 %404  ;;  %v407_v58 = vpop.xlane.xlu0 %406  ;;  %vm540_vm0 = vcmp.eq.f32.partialorder %v1835_v7, inf  ;;  %vm542_vm1 = vcmp.eq.f32.partialorder %v1835_v7, 0.0 }
 0x16f   : > { %v1168_v41 = vpop.eup %1167  ;;  %v495_v42 = vsel %vm493_vm3, %v494_v25, %v492_v40  ;;  %v499_v46 = vsel %vm498_vm4, %v452_v31, %v497_v38  ;;  %1179 = vrsqrt.f32 %v1835_v7  ;;  %v1861_v25 = vmul.f32 0.007874016, %v405_v30 }
 0x170   : > { %v1170_v50 = vpop.eup %1169  ;;  %v1852_v23 = vadd.f32 1e-06, %v495_v42  ;;  %v502_v54 = vsel %vm500_vm5, %v501_v63, %v499_v46  ;;  %v504_v57 = vmul.f32 %v1168_v41, %v1818_v48  ;;  %v529_v63 = vand.u32 2147483648, %v1826_v56 }
 0x171   : > { %v1857_v62 = vadd.f32 1e-06, %v502_v54  ;;  %v511_v21 = vmul.f32 %v1170_v50, %v1820_v49  ;;  %v1875_v27 = vmul.f32 0.007874016, %v407_v58  ;;  %v543_v50 = vand.u32 2147483648, %v1835_v7 }
 0x172   : > { %1181 = vrcp.f32 %v1852_v23  ;;  %v506_v31 = vsel %vm505_vm6, %v1818_v48, %v504_v57  ;;  %v409_v41 = vpop.xlane.xlu1 %408  ;;  %vm547_vm2 = vcmp.eq.f32.partialorder %v1861_v25, inf  ;;  %vm549_vm3 = vcmp.eq.f32.partialorder %v1861_v25, 0.0 }
 0x173   : > { %v1172_v0 = vpop.eup %1171  ;;  %1183 = vrcp.f32 %v1857_v62  ;;  %v509_v1 = vsel %vm507_vm7, %v508_v29, %v506_v31  ;;  %v513_v2 = vsel %vm512_vm8, %v1820_v49, %v511_v21  ;;  %v536_v29 = vand.u32 2147483648, %v1833_v6  ;;  %v411_v31 = vpop.xlane.xlu0 %410 }
 0x174   : > { %v1174_v32 = vpop.eup %1173  ;;  %v1877_v34 = vadd.f32 1e-06, %v509_v1  ;;  %v516_v38 = vsel %vm514_vm9, %v515_v39, %v513_v2  ;;  %v518_v40 = vmul.f32 %v1172_v0, %v1824_v55  ;;  %1185 = vrsqrt.f32 %v1861_v25 }
 0x175   : > { %v1883_v30 = vadd.f32 1e-06, %v516_v38  ;;  %v525_v48 = vmul.f32 %v1174_v32, %v1826_v56  ;;  %v1911_v1 = vmul.f32 0.007874016, %v409_v41  ;;  %v1922_v32 = vmul.f32 0.007874016, %v411_v31 }
 0x176   : > { %1187 = vrcp.f32 %v1877_v34  ;;  %v520_v49 = vsel %vm519_vm10, %v1824_v55, %v518_v40  ;;  %v413_v38 = vpop.xlane.xlu1 %412  ;;  %vm554_vm4 = vcmp.eq.f32.partialorder %v1875_v27, inf  ;;  %vm556_vm5 = vcmp.eq.f32.partialorder %v1875_v27, 0.0 }
 0x177   : > { %v1176_v39 = vpop.eup %1175  ;;  %1189 = vrcp.f32 %v1883_v30  ;;  %v523_v42 = vsel %vm521_vm11, %v522_v47, %v520_v49  ;;  %v527_v46 = vsel %vm526_vm12, %v1826_v56, %v525_v48  ;;  %v1927_v48 = vld [vmem:[%s2416_s1] ss:$0 sm:$0xff]  ;;  %vm561_vm6 = vcmp.eq.f32.partialorder %v1911_v1, inf }
 0x178   : > { %v1178_v54 = vpop.eup %1177  ;;  %v1901_v57 = vadd.f32 1e-06, %v523_v42  ;;  %v530_v58 = vsel %vm528_vm13, %v529_v63, %v527_v46  ;;  %v532_v21 = vmul.f32 %v1176_v39, %v1833_v6  ;;  %1191 = vrsqrt.f32 %v1875_v27 }
 0x179   : > { %v1180_v0 = vpop.eup %1179  ;;  %v770_v55 = vmul.f32 %v1178_v54, %v1837_v33  ;;  %v1908_v47 = vadd.f32 1e-06, %v530_v58  ;;  %v550_v39 = vand.u32 2147483648, %v1861_v25  ;;  %vm568_vm7 = vcmp.eq.f32.partialorder %v1922_v32, inf }
 0x17a   : > { %1193 = vrcp.f32 %v1901_v57  ;;  %v534_v56 = vsel %vm533_vm14, %v1833_v6, %v532_v21  ;;  %v539_v63 = vmul.f32 %v1180_v0, %v1835_v7  ;;  %v1945_v0 = vmul.f32 0.007874016, %v413_v38 }
 0x17b   : > { %v802_v2 = vsub.f32 2.0, %v770_v55  ;;  %1195 = vrcp.f32 %v1908_v47  ;;  %v537_v33 = vsel %vm535_vm15, %v536_v29, %v534_v56  ;;  %v557_v56 = vand.u32 2147483648, %v1875_v27 }
 0x17c   : > { %v1182_v40 = vpop.eup %1181  ;;  %v1929_v41 = vadd.f32 1e-06, %v537_v33  ;;  %v541_v49 = vsel %vm540_vm0, %v1835_v7, %v539_v63  ;;  %1197 = vrsqrt.f32 %v1911_v1  ;;  %vm563_vm8 = vcmp.eq.f32.partialorder %v1911_v1, 0.0 }
 0x17d   : > { %v1184_v6 = vpop.eup %1183  ;;  %v834_v29 = vmul.f32 %v1178_v54, %v802_v2  ;;  %v771_v42 = vmul.f32 %v1182_v40, %v1852_v23  ;;  %v544_v46 = vsel %vm542_vm1, %v543_v50, %v541_v49  ;;  %vm570_vm9 = vcmp.eq.f32.partialorder %v1922_v32, 0.0 }
 0x17e   : > { %v1186_v58 = vpop.eup %1185  ;;  %v772_v21 = vmul.f32 %v1184_v6, %v1857_v62  ;;  %1199 = vrcp.f32 %v1929_v41  ;;  %v1942_v31 = vadd.f32 1e-06, %v544_v46  ;;  %v1953_v62 = vld [vmem:[%s2417_s2] ss:$0 sm:$0xff]  ;;  %vm575_vm10 = vcmp.eq.f32.partialorder %v1945_v0, inf }
 0x17f   : > { %v872_v54 = vmul.f32 %v1927_v48, %v834_v29  ;;  %v803_v55 = vsub.f32 2.0, %v771_v42  ;;  %v546_v23 = vmul.f32 %v1186_v58, %v1861_v25  ;;  %1201 = vrsqrt.f32 %v1922_v32 }
 0x180   : > { %v1188_v7 = vpop.eup %1187  ;;  %v804_v50 = vsub.f32 2.0, %v772_v21  ;;  %1203 = vrcp.f32 %v1942_v31  ;;  %vm577_vm11 = vcmp.eq.f32.partialorder %v1945_v0, 0.0 }
 0x181   : > { %v1190_v2 = vpop.eup %1189  ;;  %v904_v33 = vmul.f32 %v872_v54, %v1659_v36  ;;  %v835_v38 = vmul.f32 %v1182_v40, %v803_v55  ;;  %v773_v49 = vmul.f32 %v1188_v7, %v1877_v34  ;;  %v548_v29 = vsel %vm547_vm2, %v1861_v25, %v546_v23 }
 0x182   : > { %v1192_v42 = vpop.eup %1191  ;;  %v836_v46 = vmul.f32 %v1184_v6, %v804_v50  ;;  %v774_v58 = vmul.f32 %v1190_v2, %v1883_v30  ;;  %v551_v21 = vsel %vm549_vm3, %v550_v39, %v548_v29  ;;  %1205 = vrsqrt.f32 %v1945_v0 }
 0x183   : > { %v942_v63 = vadd.f32 %v1953_v62, %v904_v33  ;;  %v873_v36 = vmul.f32 %v1927_v48, %v835_v38  ;;  %v805_v40 = vsub.f32 2.0, %v773_v49  ;;  %v1969_v34 = vadd.f32 1e-06, %v551_v21 }
 0x184   : > { %v1194_v6 = vpop.eup %1193  ;;  %v874_v30 = vmul.f32 %v1927_v48, %v836_v46  ;;  %v806_v54 = vsub.f32 2.0, %v774_v58  ;;  %v553_v25 = vmul.f32 %v1192_v42, %v1875_v27  ;;  %v571_v39 = vand.u32 2147483648, %v1922_v32  ;;  %v415_v46 = vpop.xlane.xlu0 %414 }
 0x185   : > { %v1196_v55 = vpop.eup %1195  ;;  %974 = vst [vmem:[%s1979_s8] sm:$0xff] %v942_v63  ;;  %v905_v23 = vmul.f32 %v873_v36, %v1667_v43  ;;  %v837_v50 = vmul.f32 %v1188_v7, %v805_v40  ;;  %v775_v33 = vmul.f32 %v1194_v6, %v1901_v57  ;;  %1207 = vrcp.f32 %v1969_v34 }
 0x186   : > { %v1198_v38 = vpop.eup %1197  ;;  %v906_v49 = vmul.f32 %v874_v30, %v1662_v37  ;;  %v838_v29 = vmul.f32 %v1190_v2, %v806_v54  ;;  %v776_v42 = vmul.f32 %v1196_v55, %v1908_v47  ;;  %v555_v63 = vsel %vm554_vm4, %v1875_v27, %v553_v25 }
 0x187   : > { %v943_v43 = vadd.f32 %v1953_v62, %v905_v23  ;;  %v875_v57 = vmul.f32 %v1927_v48, %v837_v50  ;;  %v807_v7 = vsub.f32 2.0, %v775_v33  ;;  %v558_v58 = vsel %vm556_vm5, %v557_v56, %v555_v63  ;;  %v417_v63 = vpop.xlane.xlu1 %416 }
 0x188   : > { %v1200_v21 = vpop.eup %1199  ;;  %v944_v37 = vadd.f32 %v1953_v62, %v906_v49  ;;  %v876_v2 = vmul.f32 %v1927_v48, %v838_v29  ;;  %v808_v47 = vsub.f32 2.0, %v776_v42  ;;  %v1997_v36 = vadd.f32 1e-06, %v558_v58 }
 0x189   : > { %v1202_v40 = vpop.eup %1201  ;;  %975 = vst [vmem:[%s1979_s8 + $0x8] sm:$0xff] %v943_v43  ;;  %v907_v30 = vmul.f32 %v875_v57, %v1670_v44  ;;  %v839_v54 = vmul.f32 %v1194_v6, %v807_v7  ;;  %v777_v25 = vmul.f32 %v1200_v21, %v1929_v41  ;;  %v560_v23 = vmul.f32 %v1198_v38, %v1911_v1  ;;  %v419_v43 = vpop.xlane.xlu0 %418 }
 0x18a   : > { %v1204_v50 = vpop.eup %1203  ;;  %976 = vst [vmem:[%s1979_s8 + $0x10] sm:$0xff] %v944_v37  ;;  %v908_v27 = vmul.f32 %v876_v2, %v1677_v51  ;;  %v840_v56 = vmul.f32 %v1196_v55, %v808_v47  ;;  %1209 = vrcp.f32 %v1997_v36  ;;  %v567_v33 = vmul.f32 %v1202_v40, %v1922_v32 }
 0x18b   : > { %v945_v49 = vadd.f32 %v1953_v62, %v907_v30  ;;  %v877_v44 = vmul.f32 %v1927_v48, %v839_v54  ;;  %v809_v6 = vsub.f32 2.0, %v777_v25  ;;  %v778_v41 = vmul.f32 %v1204_v50, %v1942_v31 }
 0x18c   : > { %v1206_v29 = vpop.eup %1205  ;;  %v946_v38 = vadd.f32 %v1953_v62, %v908_v27  ;;  %v878_v42 = vmul.f32 %v1927_v48, %v840_v56  ;;  %v562_v51 = vsel %vm561_vm6, %v1911_v1, %v560_v23  ;;  %v569_v55 = vsel %vm568_vm7, %v1922_v32, %v567_v33 }
 0x18d   : > { %977 = vst [vmem:[%s1979_s8 + $0x18] sm:$0xff] %v945_v49  ;;  %v909_v57 = vmul.f32 %v877_v44, %v1680_v52  ;;  %v841_v7 = vmul.f32 %v1200_v21, %v809_v6  ;;  %v810_v31 = vsub.f32 2.0, %v778_v41  ;;  %v2425_v58 = vand.u32 2147483648, %v1911_v1  ;;  %v423_v44 = vpop.xlane.xlu0 %422 }
 0x18e   : > { %978 = vst [vmem:[%s1979_s8 + $0x20] sm:$0xff] %v946_v38  ;;  %v910_v2 = vmul.f32 %v878_v42, %v1687_v59  ;;  %v572_v40 = vsel %vm570_vm9, %v571_v39, %v569_v55  ;;  %v574_v30 = vmul.f32 %v1206_v29, %v1945_v0  ;;  %v2040_v33 = vmul.f32 0.007874016, %v415_v46 }
 0x18f   : > { %v565_v37 = vsel %vm563_vm8, %v2425_v58, %v562_v51  ;;  %v1208_v54 = vpop.eup %1207  ;;  %v947_v52 = vadd.f32 %v1953_v62, %v909_v57  ;;  %v879_v21 = vmul.f32 %v1927_v48, %v841_v7  ;;  %v842_v25 = vmul.f32 %v1204_v50, %v810_v31 }
 0x190   : > { %v717_v47 = vadd.f32 1e-06, %v565_v37  ;;  %v718_v23 = vadd.f32 1e-06, %v572_v40  ;;  %v948_v1 = vadd.f32 %v1953_v62, %v910_v2  ;;  %v779_v27 = vmul.f32 %v1208_v54, %v1969_v34  ;;  %v421_v34 = vpop.xlane.xlu1 %420 }
 0x191   : > { %979 = vst [vmem:[%s1979_s8 + $0x28] sm:$0xff] %v947_v52  ;;  %v911_v59 = vmul.f32 %v879_v21, %v1690_v60  ;;  %v880_v32 = vmul.f32 %v1927_v48, %v842_v25  ;;  %v576_v39 = vsel %vm575_vm10, %v1945_v0, %v574_v30  ;;  %v578_v50 = vand.u32 2147483648, %v1945_v0  ;;  %v427_v7 = vpop.xlane.xlu0 %426 }
 0x192   : > { %1211 = vrcp.f32 %v717_v47  ;;  %980 = vst [vmem:[%s1979_s8 + $0x30] sm:$0xff] %v948_v1  ;;  %v811_v56 = vsub.f32 2.0, %v779_v27  ;;  %v2042_v49 = vmul.f32 0.007874016, %v417_v63  ;;  %v2048_v42 = vmul.f32 0.007874016, %v419_v43 }
 0x193   : > { %1213 = vrcp.f32 %v718_v23  ;;  %v949_v6 = vadd.f32 %v1953_v62, %v911_v59  ;;  %v912_v60 = vmul.f32 %v880_v32, %v1697_v3  ;;  %v579_v38 = vsel %vm577_vm11, %v578_v50, %v576_v39 }
 0x194   : > { %v1210_v41 = vpop.eup %1209  ;;  %v843_v29 = vmul.f32 %v1208_v54, %v811_v56  ;;  %1215 = vrsqrt.f32 %v2040_v33  ;;  %v719_v55 = vadd.f32 1e-06, %v579_v38  ;;  %v2053_v63 = vmul.f32 0.007874016, %v421_v34  ;;  %v425_v43 = vpop.xlane.xlu1 %424 }
 0x195   : > { %981 = vst [vmem:[%s1979_s8 + $0x38] sm:$0xff] %v949_v6  ;;  %v950_v46 = vadd.f32 %v1953_v62, %v912_v60  ;;  %v780_v51 = vmul.f32 %v1210_v41, %v1997_v36  ;;  %1217 = vrsqrt.f32 %v2042_v49  ;;  %vm582_vm12 = vcmp.eq.f32.partialorder %v2040_v33, inf  ;;  %v431_v50 = vpop.xlane.xlu0 %430 }
 0x196   : > { %v881_v57 = vmul.f32 %v1927_v48, %v843_v29  ;;  %1219 = vrcp.f32 %v719_v55  ;;  %vm584_vm13 = vcmp.eq.f32.partialorder %v2040_v33, 0.0  ;;  %v585_v37 = vand.u32 2147483648, %v2040_v33 }
 0x197   : > { %982 = vst [vmem:[%s1979_s8 + $0x40] sm:$0xff] %v950_v46  ;;  %v812_v3 = vsub.f32 2.0, %v780_v51  ;;  %1221 = vrsqrt.f32 %v2048_v42  ;;  %vm589_vm14 = vcmp.eq.f32.partialorder %v2042_v49, inf  ;;  %vm591_vm15 = vcmp.eq.f32.partialorder %v2042_v49, 0.0 }
 0x198   : > { %v913_v0 = vmul.f32 %v881_v57, %v1700_v4  ;;  %1223 = vrsqrt.f32 %v2053_v63  ;;  %v2066_v4 = vmul.f32 0.007874016, %v423_v44  ;;  %v2070_v54 = vmul.f32 0.007874016, %v425_v43 }
 0x199   : > { %v844_v31 = vmul.f32 %v1210_v41, %v812_v3  ;;  %v2072_v52 = vmul.f32 0.007874016, %v427_v7  ;;  %v592_v25 = vand.u32 2147483648, %v2042_v49  ;;  %vm596_vm0 = vcmp.eq.f32.partialorder %v2048_v42, inf }
 0x19a   : > { %v951_v58 = vadd.f32 %v1953_v62, %v913_v0  ;;  %1225 = vrsqrt.f32 %v2066_v4  ;;  %vm598_vm1 = vcmp.eq.f32.partialorder %v2048_v42, 0.0  ;;  %v599_v32 = vand.u32 2147483648, %v2048_v42 }
 0x19b   : > { %v882_v40 = vmul.f32 %v1927_v48, %v844_v31  ;;  %1227 = vrsqrt.f32 %v2070_v54  ;;  %vm603_vm2 = vcmp.eq.f32.partialorder %v2053_v63, inf  ;;  %vm605_vm3 = vcmp.eq.f32.partialorder %v2053_v63, 0.0 }
 0x19c   : > { %v1212_v36 = vpop.eup %1211  ;;  %983 = vst [vmem:[%s1979_s8 + $0x48] sm:$0xff] %v951_v58  ;;  %1229 = vrsqrt.f32 %v2072_v52  ;;  %v606_v6 = vand.u32 2147483648, %v2053_v63  ;;  %vm610_vm4 = vcmp.eq.f32.partialorder %v2066_v4, inf  ;;  %v613_v60 = vand.u32 2147483648, %v2066_v4 }
 0x19d   : > { %v1214_v2 = vpop.eup %1213  ;;  %v781_v30 = vmul.f32 %v1212_v36, %v717_v47  ;;  %v914_v1 = vmul.f32 %v882_v40, %v1707_v35  ;;  %vm612_vm5 = vcmp.eq.f32.partialorder %v2066_v4, 0.0  ;;  %vm617_vm6 = vcmp.eq.f32.partialorder %v2070_v54, inf }
 0x19e   : > { %v782_v21 = vmul.f32 %v1214_v2, %v718_v23  ;;  %v1216_v47 = vpop.eup %1215  ;;  %v429_v23 = vpop.xlane.xlu1 %428  ;;  %v2103_v7 = vmul.f32 0.007874016, %v431_v50  ;;  %vm619_vm7 = vcmp.eq.f32.partialorder %v2070_v54, 0.0  ;;  %vm624_vm8 = vcmp.eq.f32.partialorder %v2072_v52, inf }
 0x19f   : > { %v813_v27 = vsub.f32 2.0, %v781_v30  ;;  %v952_v39 = vadd.f32 %v1953_v62, %v914_v1  ;;  %v581_v35 = vmul.f32 %v1216_v47, %v2040_v33  ;;  %v1218_v34 = vpop.eup %1217  ;;  %v2098_v51 = vmul.f32 0.007874016, %v429_v23 }
 0x1a0   : > { %v814_v59 = vsub.f32 2.0, %v782_v21  ;;  %v1220_v41 = vpop.eup %1219  ;;  %v588_v46 = vmul.f32 %v1218_v34, %v2042_v49  ;;  %vm626_vm9 = vcmp.eq.f32.partialorder %v2072_v52, 0.0 }
 0x1a1   : > { %v845_v56 = vmul.f32 %v1212_v36, %v813_v27  ;;  %984 = vst [vmem:[%s1979_s8 + $0x50] sm:$0xff] %v952_v39  ;;  %v583_v38 = vsel %vm582_vm12, %v2040_v33, %v581_v35  ;;  %v1222_v57 = vpop.eup %1221  ;;  %v783_v0 = vmul.f32 %v1220_v41, %v719_v55  ;;  %vm631_vm10 = vcmp.eq.f32.partialorder %v2098_v51, inf }
 0x1a2   : > { %v846_v44 = vmul.f32 %v1214_v2, %v814_v59  ;;  %v586_v43 = vsel %vm584_vm13, %v585_v37, %v583_v38  ;;  %v1224_v31 = vpop.eup %1223  ;;  %v590_v2 = vsel %vm589_vm14, %v2042_v49, %v588_v46  ;;  %v595_v40 = vmul.f32 %v1222_v57, %v2048_v42 }
 0x1a3   : > { %v883_v29 = vmul.f32 %v1927_v48, %v845_v56  ;;  %v720_v58 = vadd.f32 1e-06, %v586_v43  ;;  %v815_v21 = vsub.f32 2.0, %v783_v0  ;;  %v593_v33 = vsel %vm591_vm15, %v592_v25, %v590_v2  ;;  %v433_v25 = vpop.xlane.xlu1 %432 }
 0x1a4   : > { %v884_v3 = vmul.f32 %v1927_v48, %v846_v44  ;;  %v602_v55 = vmul.f32 %v1224_v31, %v2053_v63  ;;  %v597_v1 = vsel %vm596_vm0, %v2048_v42, %v595_v40  ;;  %v1226_v27 = vpop.eup %1225  ;;  %v2154_v31 = vmul.f32 0.007874016, %v433_v25 }
 0x1a5   : > { %v915_v36 = vmul.f32 %v883_v29, %v1710_v8  ;;  %1231 = vrcp.f32 %v720_v58  ;;  %v721_v8 = vadd.f32 1e-06, %v593_v33  ;;  %v847_v59 = vmul.f32 %v1220_v41, %v815_v21  ;;  %v1228_v23 = vpop.eup %1227 }
 0x1a6   : > { %v916_v30 = vmul.f32 %v884_v3, %v1717_v45  ;;  %v600_v45 = vsel %vm598_vm1, %v599_v32, %v597_v1  ;;  %v604_v49 = vsel %vm603_vm2, %v2053_v63, %v602_v55  ;;  %v609_v35 = vmul.f32 %v1226_v27, %v2066_v4  ;;  %v435_v32 = vpop.xlane.xlu0 %434  ;;  %v1230_v44 = vpop.eup %1229 }
 0x1a7   : > { %v953_v37 = vadd.f32 %v1953_v62, %v915_v36  ;;  %1233 = vrcp.f32 %v721_v8  ;;  %v722_v39 = vadd.f32 1e-06, %v600_v45  ;;  %v607_v56 = vsel %vm605_vm3, %v606_v6, %v604_v49 }
 0x1a8   : > { %v954_v47 = vadd.f32 %v1953_v62, %v916_v30  ;;  %v885_v50 = vmul.f32 %v1927_v48, %v847_v59  ;;  %v723_v34 = vadd.f32 1e-06, %v607_v56  ;;  %v616_v42 = vmul.f32 %v1228_v23, %v2070_v54 }
 0x1a9   : > { %985 = vst [vmem:[%s1979_s8 + $0x58] sm:$0xff] %v953_v37  ;;  %1235 = vrsqrt.f32 %v2098_v51  ;;  %v611_v41 = vsel %vm610_vm4, %v2066_v4, %v609_v35  ;;  %v620_v63 = vand.u32 2147483648, %v2070_v54  ;;  %v623_v3 = vmul.f32 %v1230_v44, %v2072_v52  ;;  %v437_v4 = vpop.xlane.xlu1 %436 }
 0x1aa   : > { %986 = vst [vmem:[%s1979_s8 + $0x60] sm:$0xff] %v954_v47  ;;  %1237 = vrcp.f32 %v722_v39  ;;  %v917_v6 = vmul.f32 %v885_v50, %v1720_v10  ;;  %v614_v29 = vsel %vm612_vm5, %v613_v60, %v611_v41  ;;  %v618_v38 = vsel %vm617_vm6, %v2070_v54, %v616_v42  ;;  %v439_v2 = vpop.xlane.xlu0 %438 }
 0x1ab   : > { %1239 = vrcp.f32 %v723_v34  ;;  %v2143_v46 = vadd.f32 1e-06, %v614_v29  ;;  %v621_v57 = vsel %vm619_vm7, %v620_v63, %v618_v38  ;;  %v627_v10 = vand.u32 2147483648, %v2072_v52 }
 0x1ac   : > { %v955_v0 = vadd.f32 %v1953_v62, %v917_v6  ;;  %v725_v43 = vadd.f32 1e-06, %v621_v57  ;;  %1241 = vrsqrt.f32 %v2103_v7  ;;  %v625_v60 = vsel %vm624_vm8, %v2072_v52, %v623_v3 }
 0x1ad   : > { %1243 = vrcp.f32 %v2143_v46  ;;  %v628_v54 = vsel %vm626_vm9, %v627_v10, %v625_v60  ;;  %v2156_v36 = vmul.f32 0.007874016, %v435_v32  ;;  %v2160_v21 = vmul.f32 0.007874016, %v437_v4 }
 0x1ae   : > { %987 = vst [vmem:[%s1979_s8 + $0x68] sm:$0xff] %v955_v0  ;;  %1245 = vrcp.f32 %v725_v43  ;;  %v2158_v30 = vadd.f32 1e-06, %v628_v54  ;;  %vm633_vm11 = vcmp.eq.f32.partialorder %v2098_v51, 0.0  ;;  %v634_v52 = vand.u32 2147483648, %v2098_v51 }
 0x1af   : > { %v1232_v40 = vpop.eup %1231  ;;  %1247 = vrsqrt.f32 %v2154_v31  ;;  %v2167_v37 = vmul.f32 0.007874016, %v439_v2  ;;  %vm638_vm12 = vcmp.eq.f32.partialorder %v2103_v7, inf  ;;  %vm640_vm13 = vcmp.eq.f32.partialorder %v2103_v7, 0.0 }
 0x1b0   : > { %v784_v33 = vmul.f32 %v1232_v40, %v720_v58  ;;  %1249 = vrcp.f32 %v2158_v30  ;;  %v641_v45 = vand.u32 2147483648, %v2103_v7  ;;  %vm645_vm14 = vcmp.eq.f32.partialorder %v2154_v31, inf }
 0x1b1   : > { %v1234_v55 = vpop.eup %1233  ;;  %1251 = vrsqrt.f32 %v2156_v36  ;;  %vm647_vm15 = vcmp.eq.f32.partialorder %v2154_v31, 0.0  ;;  %v655_v42 = vand.u32 2147483648, %v2156_v36  ;;  %v662_v57 = vand.u32 2147483648, %v2160_v21 }
 0x1b2   : > { %v816_v27 = vsub.f32 2.0, %v784_v33  ;;  %v785_v47 = vmul.f32 %v1234_v55, %v721_v8  ;;  %1253 = vrsqrt.f32 %v2160_v21  ;;  %v648_v8 = vand.u32 2147483648, %v2154_v31 }
 0x1b3   : > { %v1236_v1 = vpop.eup %1235  ;;  %1255 = vrsqrt.f32 %v2167_v37  ;;  %vm652_vm0 = vcmp.eq.f32.partialorder %v2156_v36, inf  ;;  %vm659_vm1 = vcmp.eq.f32.partialorder %v2160_v21, inf  ;;  %vm654_vm2 = vcmp.eq.f32.partialorder %v2156_v36, 0.0 }
 0x1b4   : > { %v1238_v58 = vpop.eup %1237  ;;  %v630_v59 = vmul.f32 %v1236_v1, %v2098_v51  ;;  %v848_v25 = vmul.f32 %v1232_v40, %v816_v27  ;;  %v817_v23 = vsub.f32 2.0, %v785_v47  ;;  %vm661_vm3 = vcmp.eq.f32.partialorder %v2160_v21, 0.0 }
 0x1b5   : > { %v1240_v49 = vpop.eup %1239  ;;  %v786_v56 = vmul.f32 %v1238_v58, %v722_v39  ;;  %vm666_vm4 = vcmp.eq.f32.partialorder %v2167_v37, inf  ;;  %vm668_vm5 = vcmp.eq.f32.partialorder %v2167_v37, 0.0 }
 0x1b6   : > { %v787_v35 = vmul.f32 %v1240_v49, %v723_v34  ;;  %v632_v50 = vsel %vm631_vm10, %v2098_v51, %v630_v59  ;;  %v1242_v32 = vpop.eup %1241  ;;  %v886_v44 = vmul.f32 %v1927_v48, %v848_v25  ;;  %v849_v41 = vmul.f32 %v1234_v55, %v817_v23  ;;  %v441_v23 = vpop.xlane.xlu1 %440 }
 0x1b7   : > { %v818_v39 = vsub.f32 2.0, %v786_v56  ;;  %v635_v63 = vsel %vm633_vm11, %v634_v52, %v632_v50  ;;  %v1244_v6 = vpop.eup %1243  ;;  %v637_v38 = vmul.f32 %v1242_v32, %v2103_v7 }
 0x1b8   : > { %v819_v34 = vsub.f32 2.0, %v787_v35  ;;  %v2186_v29 = vadd.f32 1e-06, %v635_v63  ;;  %v1246_v3 = vpop.eup %1245  ;;  %v918_v0 = vmul.f32 %v886_v44, %v1727_v53  ;;  %v887_v10 = vmul.f32 %v1927_v48, %v849_v41 }
 0x1b9   : > { %v850_v4 = vmul.f32 %v1238_v58, %v818_v39  ;;  %v788_v60 = vmul.f32 %v1244_v6, %v2143_v46  ;;  %v789_v2 = vmul.f32 %v1246_v3, %v725_v43  ;;  %v639_v51 = vsel %vm638_vm12, %v2103_v7, %v637_v38  ;;  %v1248_v40 = vpop.eup %1247 }
 0x1ba   : > { %v851_v54 = vmul.f32 %v1240_v49, %v819_v34  ;;  %1257 = vrcp.f32 %v2186_v29  ;;  %v956_v53 = vadd.f32 %v1953_v62, %v918_v0  ;;  %v919_v33 = vmul.f32 %v887_v10, %v1730_v12  ;;  %v1250_v43 = vpop.eup %1249 }
 0x1bb   : > { %v888_v46 = vmul.f32 %v1927_v48, %v850_v4  ;;  %v820_v55 = vsub.f32 2.0, %v788_v60  ;;  %v821_v1 = vsub.f32 2.0, %v789_v2  ;;  %v642_v27 = vsel %vm640_vm13, %v641_v45, %v639_v51  ;;  %v1252_v12 = vpop.eup %1251 }
 0x1bc   : > { %v889_v52 = vmul.f32 %v1927_v48, %v851_v54  ;;  %v644_v47 = vmul.f32 %v1248_v40, %v2154_v31  ;;  %988 = vst [vmem:[%s1979_s8 + $0x70] sm:$0xff] %v956_v53  ;;  %v957_v58 = vadd.f32 %v1953_v62, %v919_v33  ;;  %v790_v25 = vmul.f32 %v1250_v43, %v2158_v30  ;;  %v1254_v56 = vpop.eup %1253  ;;  %v443_v54 = vpop.xlane.xlu0 %442 }
 0x1bd   : > { %v920_v59 = vmul.f32 %v888_v46, %v1737_v61  ;;  %v852_v49 = vmul.f32 %v1244_v6, %v820_v55  ;;  %v853_v35 = vmul.f32 %v1246_v3, %v821_v1  ;;  %v728_v45 = vadd.f32 1e-06, %v642_v27  ;;  %v1256_v41 = vpop.eup %1255 }
 0x1be   : > { %v921_v7 = vmul.f32 %v889_v52, %v1740_v14  ;;  %v646_v50 = vsel %vm645_vm14, %v2154_v31, %v644_v47  ;;  %989 = vst [vmem:[%s1979_s8 + $0x78] sm:$0xff] %v957_v58  ;;  %v822_v30 = vsub.f32 2.0, %v790_v25  ;;  %v651_v38 = vmul.f32 %v1252_v12, %v2156_v36 }
 0x1bf   : > { %v958_v61 = vadd.f32 %v1953_v62, %v920_v59  ;;  %v890_v32 = vmul.f32 %v1927_v48, %v852_v49  ;;  %v649_v44 = vsel %vm647_vm15, %v648_v8, %v646_v50  ;;  %v891_v14 = vmul.f32 %v1927_v48, %v853_v35 }
 0x1c0   : > { %v959_v39 = vadd.f32 %v1953_v62, %v921_v7  ;;  %1259 = vrcp.f32 %v728_v45  ;;  %v729_v63 = vadd.f32 1e-06, %v649_v44  ;;  %v854_v34 = vmul.f32 %v1250_v43, %v822_v30 }
 0x1c1   : > { %990 = vst [vmem:[%s1979_s8 + $0x80] sm:$0xff] %v958_v61  ;;  %v922_v6 = vmul.f32 %v890_v32, %v1747_v5  ;;  %v658_v3 = vmul.f32 %v1254_v56, %v2160_v21  ;;  %v923_v31 = vmul.f32 %v891_v14, %v1750_v16  ;;  %v665_v8 = vmul.f32 %v1256_v41, %v2167_v37  ;;  %v445_v16 = vpop.xlane.xlu1 %444 }
 0x1c2   : > { %991 = vst [vmem:[%s1979_s8 + $0x88] sm:$0xff] %v959_v39  ;;  %1261 = vrcp.f32 %v729_v63  ;;  %v669_v0 = vand.u32 2147483648, %v2167_v37  ;;  %v892_v4 = vmul.f32 %v1927_v48, %v854_v34  ;;  %v653_v5 = vsel %vm652_vm0, %v2156_v36, %v651_v38 }
 0x1c3   : > { %v960_v10 = vadd.f32 %v1953_v62, %v922_v6  ;;  %v660_v60 = vsel %vm659_vm1, %v2160_v21, %v658_v3  ;;  %v961_v51 = vadd.f32 %v1953_v62, %v923_v31  ;;  %v656_v40 = vsel %vm654_vm2, %v655_v42, %v653_v5 }
 0x1c4   : > { %v1258_v2 = vpop.eup %1257  ;;  %v663_v53 = vsel %vm661_vm3, %v662_v57, %v660_v60  ;;  %v667_v33 = vsel %vm666_vm4, %v2167_v37, %v665_v8  ;;  %v924_v46 = vmul.f32 %v892_v4, %v1757_v9  ;;  %v730_v43 = vadd.f32 1e-06, %v656_v40 }
 0x1c5   : > { %992 = vst [vmem:[%s1979_s8 + $0x90] sm:$0xff] %v960_v10  ;;  %v791_v55 = vmul.f32 %v1258_v2, %v2186_v29  ;;  %v731_v52 = vadd.f32 1e-06, %v663_v53  ;;  %993 = vst [vmem:[%s1979_s8 + $0x98] sm:$0xff] %v961_v51  ;;  %v670_v36 = vsel %vm668_vm5, %v669_v0, %v667_v33  ;;  %v2259_v42 = vmul.f32 0.007874016, %v441_v23  ;;  %v447_v29 = vpop.xlane.xlu0 %446  ;;  %v449_v12 = vpop.xlane.xlu1 %448 }
 0x1c6   : > { %v2261_v21 = vmul.f32 0.007874016, %v443_v54  ;;  %v962_v57 = vadd.f32 %v1953_v62, %v924_v46  ;;  %1263 = vrcp.f32 %v730_v43  ;;  %v732_v27 = vadd.f32 1e-06, %v670_v36 }
 0x1c7   : > { %v823_v1 = vsub.f32 2.0, %v791_v55  ;;  %1265 = vrcp.f32 %v731_v52  ;;  %v2264_v47 = vmul.f32 0.007874016, %v445_v16  ;;  %v2271_v25 = vmul.f32 0.007874016, %v447_v29 }
 0x1c8   : > { %994 = vst [vmem:[%s1979_s8 + $0xa0] sm:$0xff] %v962_v57  ;;  %1267 = vrcp.f32 %v732_v27  ;;  %v2273_v23 = vmul.f32 0.007874016, %v449_v12  ;;  %vm673_vm6 = vcmp.eq.f32.partialorder %v2259_v42, inf  ;;  %vm675_vm7 = vcmp.eq.f32.partialorder %v2259_v42, 0.0 }
 0x1c9   : > { %v855_v9 = vmul.f32 %v1258_v2, %v823_v1  ;;  %1269 = vrsqrt.f32 %v2259_v42  ;;  %v676_v32 = vand.u32 2147483648, %v2259_v42  ;;  %vm680_vm8 = vcmp.eq.f32.partialorder %v2261_v21, inf }
 0x1ca   : > { %v1260_v58 = vpop.eup %1259  ;;  %1271 = vrsqrt.f32 %v2261_v21  ;;  %vm682_vm9 = vcmp.eq.f32.partialorder %v2261_v21, 0.0  ;;  %v683_v14 = vand.u32 2147483648, %v2261_v21  ;;  %vm687_vm10 = vcmp.eq.f32.partialorder %v2264_v47, inf }
 0x1cb   : > { %v893_v37 = vmul.f32 %v1927_v48, %v855_v9  ;;  %v792_v59 = vmul.f32 %v1260_v58, %v728_v45  ;;  %1273 = vrsqrt.f32 %v2264_v47  ;;  %vm689_vm11 = vcmp.eq.f32.partialorder %v2264_v47, 0.0 }
 0x1cc   : > { %v1262_v49 = vpop.eup %1261  ;;  %1275 = vrsqrt.f32 %v2271_v25  ;;  %v690_v3 = vand.u32 2147483648, %v2264_v47  ;;  %vm694_vm12 = vcmp.eq.f32.partialorder %v2271_v25, inf  ;;  %v697_v10 = vand.u32 2147483648, %v2271_v25 }
 0x1cd   : > { %v925_v56 = vmul.f32 %v893_v37, %v1760_v18  ;;  %v824_v7 = vsub.f32 2.0, %v792_v59  ;;  %v793_v35 = vmul.f32 %v1262_v49, %v729_v63  ;;  %1277 = vrsqrt.f32 %v2273_v23 }
 0x1ce   : > { %vm696_vm13 = vcmp.eq.f32.partialorder %v2271_v25, 0.0  ;;  %vm701_vm14 = vcmp.eq.f32.partialorder %v2273_v23, inf  ;;  %vm703_vm15 = vcmp.eq.f32.partialorder %v2273_v23, 0.0 }
 0x1cf   : > { %v963_v50 = vadd.f32 %v1953_v62, %v925_v56  ;;  %v856_v61 = vmul.f32 %v1260_v58, %v824_v7  ;;  %v825_v45 = vsub.f32 2.0, %v793_v35 }
 0x1d0   : > { %v1264_v30 = vpop.eup %1263 }
 0x1d1   : > { %995 = vst [vmem:[%s1979_s8 + $0xa8] sm:$0xff] %v963_v50  ;;  %v894_v18 = vmul.f32 %v1927_v48, %v856_v61  ;;  %v857_v44 = vmul.f32 %v1262_v49, %v825_v45  ;;  %v1266_v41 = vpop.eup %1265  ;;  %v794_v39 = vmul.f32 %v1264_v30, %v730_v43 }
 0x1d2   : > { %v1268_v63 = vpop.eup %1267  ;;  %v795_v38 = vmul.f32 %v1266_v41, %v731_v52 }
 0x1d3   : > { %v926_v6 = vmul.f32 %v894_v18, %v1767_v11  ;;  %v895_v34 = vmul.f32 %v1927_v48, %v857_v44  ;;  %v1270_v31 = vpop.eup %1269  ;;  %v826_v8 = vsub.f32 2.0, %v794_v39  ;;  %v796_v0 = vmul.f32 %v1268_v63, %v732_v27 }
 0x1d4   : > { %v1272_v4 = vpop.eup %1271  ;;  %v827_v54 = vsub.f32 2.0, %v795_v38  ;;  %v672_v11 = vmul.f32 %v1270_v31, %v2259_v42 }
 0x1d5   : > { %v964_v5 = vadd.f32 %v1953_v62, %v926_v6  ;;  %v927_v60 = vmul.f32 %v895_v34, %v1770_v20  ;;  %v1274_v16 = vpop.eup %1273  ;;  %v858_v2 = vmul.f32 %v1264_v30, %v826_v8  ;;  %v828_v51 = vsub.f32 2.0, %v796_v0 }
 0x1d6   : > { %v679_v40 = vmul.f32 %v1272_v4, %v2261_v21  ;;  %v859_v33 = vmul.f32 %v1266_v41, %v827_v54  ;;  %v674_v20 = vsel %vm673_vm6, %v2259_v42, %v672_v11  ;;  %v686_v46 = vmul.f32 %v1274_v16, %v2264_v47  ;;  %v1276_v55 = vpop.eup %1275 }
 0x1d7   : > { %996 = vst [vmem:[%s1979_s8 + $0xb0] sm:$0xff] %v964_v5  ;;  %v965_v53 = vadd.f32 %v1953_v62, %v927_v60  ;;  %v896_v43 = vmul.f32 %v1927_v48, %v858_v2  ;;  %v860_v52 = vmul.f32 %v1268_v63, %v828_v51  ;;  %v677_v36 = vsel %vm675_vm7, %v676_v32, %v674_v20  ;;  %v1278_v1 = vpop.eup %1277 }
 0x1d8   : > { %v681_v57 = vsel %vm680_vm8, %v2261_v21, %v679_v40  ;;  %v897_v27 = vmul.f32 %v1927_v48, %v859_v33  ;;  %v733_v9 = vadd.f32 1e-06, %v677_v36  ;;  %v688_v12 = vsel %vm687_vm10, %v2264_v47, %v686_v46 }
 0x1d9   : > { %997 = vst [vmem:[%s1979_s8 + $0xb8] sm:$0xff] %v965_v53  ;;  %v684_v29 = vsel %vm682_vm9, %v683_v14, %v681_v57  ;;  %v928_v58 = vmul.f32 %v896_v43, %v1777_v13  ;;  %v898_v42 = vmul.f32 %v1927_v48, %v860_v52  ;;  %v691_v59 = vsel %vm689_vm11, %v690_v3, %v688_v12 }
 0x1da   : > { %v734_v37 = vadd.f32 1e-06, %v684_v29  ;;  %v929_v49 = vmul.f32 %v897_v27, %v1780_v22  ;;  %1279 = vrcp.f32 %v733_v9  ;;  %v735_v56 = vadd.f32 1e-06, %v691_v59 }
 0x1db   : > { %v693_v21 = vmul.f32 %v1276_v55, %v2271_v25  ;;  %v966_v7 = vadd.f32 %v1953_v62, %v928_v58  ;;  %v930_v35 = vmul.f32 %v898_v42, %v1787_v15  ;;  %v700_v13 = vmul.f32 %v1278_v1, %v2273_v23 }
 0x1dc   : > { %1281 = vrcp.f32 %v734_v37  ;;  %v967_v50 = vadd.f32 %v1953_v62, %v929_v49  ;;  %v704_v47 = vand.u32 2147483648, %v2273_v23 }
 0x1dd   : > { %1283 = vrcp.f32 %v735_v56  ;;  %v695_v22 = vsel %vm694_vm12, %v2271_v25, %v693_v21  ;;  %998 = vst [vmem:[%s1979_s8 + $0xc0] sm:$0xff] %v966_v7  ;;  %v968_v61 = vadd.f32 %v1953_v62, %v930_v35  ;;  %v702_v15 = vsel %vm701_vm14, %v2273_v23, %v700_v13 }
 0x1de   : > { %v698_v45 = vsel %vm696_vm13, %v697_v10, %v695_v22  ;;  %999 = vst [vmem:[%s1979_s8 + $0xc8] sm:$0xff] %v967_v50  ;;  %v705_v30 = vsel %vm703_vm15, %v704_v47, %v702_v15 }
 0x1df   : > { %v736_v32 = vadd.f32 1e-06, %v698_v45  ;;  %1000 = vst [vmem:[%s1979_s8 + $0xd0] sm:$0xff] %v968_v61  ;;  %v737_v18 = vadd.f32 1e-06, %v705_v30 }
 0x1e1   : > { %1285 = vrcp.f32 %v736_v32 }
 0x1e2   : > { %1287 = vrcp.f32 %v737_v18 }
 0x1e4   : > { %v1280_v44 = vpop.eup %1279 }
 0x1e5   : > { %v797_v39 = vmul.f32 %v1280_v44, %v733_v9 }
 0x1e6   : > { %v1282_v41 = vpop.eup %1281 }
 0x1e7   : > { %v1284_v14 = vpop.eup %1283  ;;  %v798_v63 = vmul.f32 %v1282_v41, %v734_v37  ;;  %v829_v25 = vsub.f32 2.0, %v797_v39 }
 0x1e8   : > { %v799_v6 = vmul.f32 %v1284_v14, %v735_v56 }
 0x1e9   : > { %v830_v34 = vsub.f32 2.0, %v798_v63  ;;  %v861_v38 = vmul.f32 %v1280_v44, %v829_v25 }
 0x1ea   : > { %v831_v3 = vsub.f32 2.0, %v799_v6 }
 0x1eb   : > { %v1286_v31 = vpop.eup %1285  ;;  %v862_v8 = vmul.f32 %v1282_v41, %v830_v34  ;;  %v899_v0 = vmul.f32 %v1927_v48, %v861_v38 }
 0x1ec   : > { %v1288_v23 = vpop.eup %1287  ;;  %v863_v10 = vmul.f32 %v1284_v14, %v831_v3  ;;  %v800_v4 = vmul.f32 %v1286_v31, %v736_v32 }
 0x1ed   : > { %v900_v5 = vmul.f32 %v1927_v48, %v862_v8  ;;  %v801_v60 = vmul.f32 %v1288_v23, %v737_v18  ;;  %v931_v54 = vmul.f32 %v899_v0, %v1790_v24 }
 0x1ee   : > { %v901_v11 = vmul.f32 %v1927_v48, %v863_v10  ;;  %v832_v16 = vsub.f32 2.0, %v800_v4 }
 0x1ef   : > { %v932_v2 = vmul.f32 %v900_v5, %v1797_v17  ;;  %v833_v51 = vsub.f32 2.0, %v801_v60  ;;  %v969_v40 = vadd.f32 %v1953_v62, %v931_v54  ;;  %v1289_v17 = vld [vmem:[%s2416_s1] ss:$0 sm:$0xff] }
 0x1f0   : > { %v933_v53 = vmul.f32 %v901_v11, %v1800_v26  ;;  %v864_v33 = vmul.f32 %v1286_v31, %v832_v16 }
 0x1f1   : > { %v970_v20 = vadd.f32 %v1953_v62, %v932_v2  ;;  %v865_v46 = vmul.f32 %v1288_v23, %v833_v51  ;;  %1001 = vst [vmem:[%s1979_s8 + $0xd8] sm:$0xff] %v969_v40 }
 0x1f2   : > { %v971_v24 = vadd.f32 %v1953_v62, %v933_v53  ;;  %v902_v48 = vmul.f32 %v1289_v17, %v864_v33 }
 0x1f3   : > { %1002 = vst [vmem:[%s1979_s8 + $0xe0] sm:$0xff] %v970_v20  ;;  %v903_v55 = vmul.f32 %v1289_v17, %v865_v46 }
 0x1f4   : > { %1003 = vst [vmem:[%s1979_s8 + $0xe8] sm:$0xff] %v971_v24  ;;  %v934_v26 = vmul.f32 %v902_v48, %v1807_v19 }
 0x1f5   : > { %v935_v43 = vmul.f32 %v903_v55, %v1810_v28 }
 0x1f6   : > { %v972_v52 = vadd.f32 %v1953_v62, %v934_v26 }
 0x1f7   : > { %v973_v36 = vadd.f32 %v1953_v62, %v935_v43 }
 0x1f8   : > { %1004 = vst [vmem:[%s1979_s8 + $0xf0] sm:$0xff] %v972_v52 }
 0x1f9   : > { %1005 = vst [vmem:[%s1979_s8 + $0xf8] sm:$0xff] %v973_v36 }
 0x1fa   : > { %1333 = shalt.err (!%p1330_p2)
}
 0x1fb   : > { %s1334_s11 = scalar_lea.hbm %s2366_s28, 4096  ;;  %s1338_s6 = scalar_lea.hbm %s2418_s3, 8192 }
 0x1fc   : > { %p1335_p4 = scmp.ne.s32.totalorder %s2366_s28, %s1334_s11  ;;  %p1339_p9 = scmp.lt.u32.totalorder %s2366_s28, %s2418_s3 }
 0x1fd   : > { %p1340_p1 = scmp.lt.u32.totalorder %s1338_s6, %s1334_s11  ;;  %p1342_p6 = scmp.lt.u32.totalorder %s1334_s11, %s2366_s28 }
 0x1fe   : > { %p1336_p5 = pnand %p1335_p4, %p2426_p11 }
 0x1ff   : > { %p1341_p3 = por %p1340_p1, %p1339_p9 }
 0x200   : > { %p1337_p7 = pneg %p1336_p5 }
 0x201   : > { %p1343_p12 = por %p1342_p6, %p1341_p3 }
 0x203   : > { %p1344_p13 = pnand %p1343_p12, %p1337_p7 }
 0x205   : > { %1347 = shalt.err (!%p1344_p13)
}
 0x206   : > { %s1392_s17 = smov 128   ;;  %s1393_s19 = smov 8  }
 0x207   : > { %1113 = dma.vmem_to_hbm [thread:$0]  (%p2426_p11), %s2369_s22, 4096, %s2366_s28, %s1007_s16, %s1392_s17, %s1392_s17, %s1393_s19  }
 0x208 PF: > { %s1035_s20 = sand.u32 1, %s1374_s12   ;;  %p2427_p8 = scmp.ne.s32.totalorder %s2423_s25, 0 }
 0x209   : > { %p2428_p10 = scmp.ge.s32.totalorder %s1386_s15, 2  ;;  %s1036_s26 = scalar_lea.sflag [#allocation4], %s1035_s20 }
 0x20b   : > { %p1120_p0 = pnand %p2428_p10, %p2427_p8 }
 0x20d   : > { %1369 = dma.done.wait (!%p1120_p0), %s1036_s26, 4096  }
 0x20e   : > { %1371 = vsyncadd (!%p1120_p0), %s1036_s26, 4294963200  ;;  %p16_p2 = scmp.ge.s32.totalorder %s1439_s18, 4   ;;  %s2429_s12 = smov %s1378_s13 }
 0x20f   : > { %s2430_s13 = smov %s1382_s14  ;;  %s2431_s14 = smov %s1451_s21 }
 0x210   : > { %s2432_s15 = smov %s1439_s18  ;;  %18 = sbr.rel (!%p16_p2) target bundleno = 5 (0x5), region = 77 }
 0x217   :  { %1041 = vsyncpa [#allocation3], 1 }
 0x218   :  { %1043 = vsyncpa [#allocation3 + $0x1], 1 }
 0x219   :  { %1044 = vsyncpa [#allocation4], 1 }
 0x21a   :  { %1046 = vsyncpa [#allocation4 + $0x1], 1 }

</bundles_post_ra>
